<compile_context>
chip_gen: v6e
topology: v6e:2x2x1
jax: 0.10.0
libtpu: 0.0.40
codegen_flags: <defaults>
</compile_context>

<pallas_src>
import jax
import jax.numpy as jnp
from jax.experimental import pallas as pl
from jax.experimental.pallas import tpu as pltpu


def _fused_mlp1x1_kernel(x_ref, w1_ref, b1_ref, w2_ref, b2_ref, o_ref):
    # Fused: ReLU((ReLU(x @ W1 + b1)) @ W2 + b2) on one (tm, Cin) row tile.
    x = x_ref[...]
    h = jnp.dot(x, w1_ref[...], preferred_element_type=jnp.float32) + b1_ref[...]
    h = jnp.maximum(h, 0.0)
    y = jnp.dot(h, w2_ref[...], preferred_element_type=jnp.float32) + b2_ref[...]
    y = jnp.maximum(y, 0.0)
    o_ref[...] = y.astype(o_ref.dtype)


def fused_embed_rows(x_rows, w1, b1, w2, b2):
    """ReLU((ReLU(x @ W1 + b1)) @ W2 + b2) over row-major (M, Cin) input.

    x_rows : (M, Cin) float32, M % 8 == 0
    w1     : (Cin, hid), b1: (1, hid)
    w2     : (hid, Cout), b2: (1, Cout)
    returns: (M, Cout)
    """
    M, Cin = x_rows.shape
    hid = w1.shape[1]
    Cout = w2.shape[1]
    assert M % 8 == 0, "row count must be sublane-aligned"

    # 2 full-height blocks -> both v7x TensorCores busy; 1 block fallback.
    nblk = 2 if (M % 16 == 0) else 1
    tm = M // nblk

    return pl.pallas_call(
        _fused_mlp1x1_kernel,
        out_shape=jax.ShapeDtypeStruct((M, Cout), x_rows.dtype),
        grid_spec=pltpu.PrefetchScalarGridSpec(
            num_scalar_prefetch=0,
            grid=(nblk,),
            in_specs=[
                pl.BlockSpec((tm, Cin), lambda i: (i, 0)),     # row tile of x
                pl.BlockSpec((Cin, hid), lambda i: (0, 0)),    # fused W1 (full)
                pl.BlockSpec((1, hid), lambda i: (0, 0)),      # fused b1
                pl.BlockSpec((hid, Cout), lambda i: (0, 0)),   # fused W2 (full)
                pl.BlockSpec((1, Cout), lambda i: (0, 0)),     # fused b2
            ],
            out_specs=pl.BlockSpec((tm, Cout), lambda i: (i, 0)),
        ),
        compiler_params=pltpu.CompilerParams(
            dimension_semantics=("parallel",)),
    )(x_rows, w1, b1, w2, b2)


def _init_conv1x1_params(key, cin, cout):
    """Deterministic PyTorch-like Conv2d(k=1) init: U(-1/sqrt(fan_in), ..)."""
    kw, kb = jax.random.split(key)
    bound = 1.0 / jnp.sqrt(jnp.float32(cin))
    w = jax.random.uniform(kw, (cin, cout), jnp.float32, -bound, bound)
    b = jax.random.uniform(kb, (1, cout), jnp.float32, -bound, bound)
    return w, b


def fuse_params(params, V, seg, hid, out_jpt_ch, out_frm_ch):
    """Build block-diagonal fused weights so one kernel computes both branches.

    Zero off-diagonal blocks guarantee the fused result is bit-identical to
    running the two branches separately (ReLU is elementwise).
    """
    w1j, b1j, w2j, b2j = params["jpt"]
    w1f, b1f, w2f, b2f = params["frm"]
    w1 = jnp.zeros((V + seg, 2 * hid), jnp.float32)
    w1 = w1.at[:V, :hid].set(w1j).at[V:, hid:].set(w1f)
    b1 = jnp.concatenate([b1j, b1f], axis=1)
    w2 = jnp.zeros((2 * hid, out_jpt_ch + out_frm_ch), jnp.float32)
    w2 = w2.at[:hid, :out_jpt_ch].set(w2j).at[hid:, out_jpt_ch:].set(w2f)
    b2 = jnp.concatenate([b2j, b2f], axis=1)
    return w1, b1, w2, b2


def build_row_inputs(N, V, seg):
    """Module constants built directly in (N*H*W, C) row layout (no transposes).

    idx_jpt NCHW (N, V, V, seg): [b, c, h, w] = (h == c)  -> row (b,h,w) = e_h
    idx_frm NCHW (N, seg, V, seg): [b, c, h, w] = (w == c) -> row (b,h,w) = e_w
    Both share the pixel grid (H=V, W=seg), so rows are concatenated on channels.
    """
    x_jpt = jnp.tile(jnp.repeat(jnp.eye(V, dtype=jnp.float32), seg, axis=0), (N, 1))
    x_frm = jnp.tile(jnp.eye(seg, dtype=jnp.float32), (N * V, 1))
    return jnp.concatenate([x_jpt, x_frm], axis=1)           # (N*V*seg, V+seg)


def block_idx_info_forward(fused_params, x_rows, N, V, seg, out_jpt_ch):
    w1, b1, w2, b2 = fused_params
    out = fused_embed_rows(x_rows, w1, b1, w2, b2)           # (N*V*seg, 320)
    out_jpt = out[:, :out_jpt_ch].reshape(N, V, seg, out_jpt_ch)
    out_frm = out[:, out_jpt_ch:].reshape(N, V, seg, -1)
    # Back to PyTorch NCHW: (N, Cout, V, seg) to match module output semantics.
    return (jnp.transpose(out_jpt, (0, 3, 1, 2)),
            jnp.transpose(out_frm, (0, 3, 1, 2)))


# ---------------- pure-JAX reference (module semantics, NCHW) ----------------

def make_one_hot(bs, dim1, dim2):
    """Mirror of block_idx_info.one_hot: (bs, dim1, dim2, dim2) identity."""
    eye = jnp.eye(dim2, dtype=jnp.float32)
    return jnp.broadcast_to(eye, (bs, dim1, dim2, dim2))


def _reference_embed(x_nchw, w1, b1, w2, b2):
    x = jnp.transpose(x_nchw, (0, 2, 3, 1))
    h = jnp.maximum(x @ w1 + b1[0], 0.0)
    y = jnp.maximum(h @ w2 + b2[0], 0.0)
    return jnp.transpose(y, (0, 3, 1, 2))


if __name__ == "__main__":
    # Small, module-consistent config:
    #   sample_num (train batch) = 2, seg = 8, V = 25 (hardcoded in module),
    #   out_jpt_channels = 64, out_frm_channels = 256, hidden = 64 per branch.
    N = 2
    seg = 8
    V = 25
    hid = 64
    out_jpt_ch = 64
    out_frm_ch = 64 * 4

    key = jax.random.PRNGKey(0)
    k1, k2, k3, k4 = jax.random.split(key, 4)
    params = {
        "jpt": _init_conv1x1_params(k1, V, hid) + _init_conv1x1_params(k2, hid, out_jpt_ch),
        "frm": _init_conv1x1_params(k3, seg, hid) + _init_conv1x1_params(k4, hid, out_frm_ch),
    }

    fused = fuse_params(params, V, seg, hid, out_jpt_ch, out_frm_ch)
    x_rows = build_row_inputs(N, V, seg)                     # (400, 33)

    fwd = jax.jit(block_idx_info_forward, static_argnums=(2, 3, 4, 5))
    out_jpt, out_frm = fwd(fused, x_rows, N, V, seg, out_jpt_ch)
    jax.block_until_ready((out_jpt, out_frm))

    assert out_jpt.shape == (N, out_jpt_ch, V, seg)
    assert out_frm.shape == (N, out_frm_ch, V, seg)

    # Silent correctness check against a pure-JAX reference on the module's
    # original NCHW constants (validates both the math and the row layout).
    idx_jpt = jnp.transpose(make_one_hot(N, seg, V), (0, 3, 2, 1))  # (N, V, V, seg)
    idx_frm = jnp.transpose(make_one_hot(N, V, seg), (0, 3, 1, 2))  # (N, seg, V, seg)
    ref_jpt = _reference_embed(idx_jpt, *params["jpt"])
    ref_frm = _reference_embed(idx_frm, *params["frm"])
    assert jnp.allclose(out_jpt, ref_jpt, atol=1e-5, rtol=1e-5)
    assert jnp.allclose(out_frm, ref_frm, atol=1e-5, rtol=1e-5)

    print("KERNEL_OK")
</pallas_src>

<mosaic_0001>
module attributes {stable_mosaic.version = 11 : i64} {
  func.func @_fused_mlp1x1_kernel(%arg0: i32, %arg1: memref<200x33xf32, #tpu.memory_space<vmem>>, %arg2: memref<33x128xf32, #tpu.memory_space<vmem>>, %arg3: memref<1x128xf32, #tpu.memory_space<vmem>>, %arg4: memref<128x320xf32, #tpu.memory_space<vmem>>, %arg5: memref<1x320xf32, #tpu.memory_space<vmem>>, %arg6: memref<200x320xf32, #tpu.memory_space<vmem>>) attributes {dimension_semantics = [#tpu.dimension_semantics<parallel>], iteration_bounds = array<i64: 2>, scalar_prefetch = 0 : i64, scratch_operands = 0 : i64, tpu.core_type = #tpu.core_type<tc>, window_params = [{transform_indices = @transform_0, window_bounds = array<i64: 200, 33>}, {pipeline_mode = #tpu.pipeline_mode<synchronous>, transform_indices = @transform_1, window_bounds = array<i64: 33, 128>}, {pipeline_mode = #tpu.pipeline_mode<synchronous>, transform_indices = @transform_2, window_bounds = array<i64: 1, 128>}, {pipeline_mode = #tpu.pipeline_mode<synchronous>, transform_indices = @transform_3, window_bounds = array<i64: 128, 320>}, {pipeline_mode = #tpu.pipeline_mode<synchronous>, transform_indices = @transform_4, window_bounds = array<i64: 1, 320>}, {transform_indices = @transform_5, window_bounds = array<i64: 200, 320>}]} {
    %c0 = arith.constant 0 : index
    %c0_0 = arith.constant 0 : index
    %0 = vector.load %arg1[%c0, %c0_0] : memref<200x33xf32, #tpu.memory_space<vmem>>, vector<200x33xf32>
    %c0_1 = arith.constant 0 : index
    %c0_2 = arith.constant 0 : index
    %1 = vector.load %arg2[%c0_1, %c0_2] : memref<33x128xf32, #tpu.memory_space<vmem>>, vector<33x128xf32>
    %cst = arith.constant dense<0.000000e+00> : vector<200x128xf32>
    %2 = tpu.matmul %0, %1, %cst {dimension_numbers = #tpu.dot_dimension_numbers<[1], [0], [0], [1], [0, 0, 1, 1], [], []>} : vector<200x33xf32>, vector<33x128xf32>, vector<200x128xf32> -> vector<200x128xf32>
    %c0_3 = arith.constant 0 : index
    %c0_4 = arith.constant 0 : index
    %3 = vector.load %arg3[%c0_3, %c0_4] : memref<1x128xf32, #tpu.memory_space<vmem>>, vector<1x128xf32>
    %4 = vector.broadcast %3 : vector<1x128xf32> to vector<200x128xf32>
    %5 = arith.addf %2, %4 : vector<200x128xf32>
    %cst_5 = arith.constant 0.000000e+00 : f32
    %6 = vector.broadcast %cst_5 : f32 to vector<200x128xf32>
    %7 = arith.maximumf %5, %6 : vector<200x128xf32>
    %c0_6 = arith.constant 0 : index
    %c0_7 = arith.constant 0 : index
    %8 = vector.load %arg4[%c0_6, %c0_7] : memref<128x320xf32, #tpu.memory_space<vmem>>, vector<128x320xf32>
    %cst_8 = arith.constant dense<0.000000e+00> : vector<200x320xf32>
    %9 = tpu.matmul %7, %8, %cst_8 {dimension_numbers = #tpu.dot_dimension_numbers<[1], [0], [0], [1], [0, 0, 1, 1], [], []>} : vector<200x128xf32>, vector<128x320xf32>, vector<200x320xf32> -> vector<200x320xf32>
    %c0_9 = arith.constant 0 : index
    %c0_10 = arith.constant 0 : index
    %10 = vector.load %arg5[%c0_9, %c0_10] : memref<1x320xf32, #tpu.memory_space<vmem>>, vector<1x320xf32>
    %11 = vector.broadcast %10 : vector<1x320xf32> to vector<200x320xf32>
    %12 = arith.addf %9, %11 : vector<200x320xf32>
    %cst_11 = arith.constant 0.000000e+00 : f32
    %13 = vector.broadcast %cst_11 : f32 to vector<200x320xf32>
    %14 = arith.maximumf %12, %13 : vector<200x320xf32>
    %c0_12 = arith.constant 0 : index
    %c0_13 = arith.constant 0 : index
    %15 = vector.load %arg6[%c0_12, %c0_13] : memref<200x320xf32, #tpu.memory_space<vmem>>, vector<200x320xf32>
    tpu.vector_store %arg6[%c0_12, %c0_13], %14 {strides = array<i32>} : memref<200x320xf32, #tpu.memory_space<vmem>>, vector<200x320xf32>,
    return
  }
  func.func @transform_0(%arg0: i32) -> (i32, i32) {
    %c0_i32 = arith.constant 0 : i32
    %c0_i32_0 = arith.constant 0 : i32
    return %arg0, %c0_i32 : i32, i32
  }
  func.func @transform_1(%arg0: i32) -> (i32, i32) {
    %c0_i32 = arith.constant 0 : i32
    %c0_i32_0 = arith.constant 0 : i32
    %c0_i32_1 = arith.constant 0 : i32
    return %c0_i32, %c0_i32_0 : i32, i32
  }
  func.func @transform_2(%arg0: i32) -> (i32, i32) {
    %c0_i32 = arith.constant 0 : i32
    %c0_i32_0 = arith.constant 0 : i32
    %c0_i32_1 = arith.constant 0 : i32
    return %c0_i32, %c0_i32_0 : i32, i32
  }
  func.func @transform_3(%arg0: i32) -> (i32, i32) {
    %c0_i32 = arith.constant 0 : i32
    %c0_i32_0 = arith.constant 0 : i32
    %c0_i32_1 = arith.constant 0 : i32
    return %c0_i32, %c0_i32_0 : i32, i32
  }
  func.func @transform_4(%arg0: i32) -> (i32, i32) {
    %c0_i32 = arith.constant 0 : i32
    %c0_i32_0 = arith.constant 0 : i32
    %c0_i32_1 = arith.constant 0 : i32
    return %c0_i32, %c0_i32_0 : i32, i32
  }
  func.func @transform_5(%arg0: i32) -> (i32, i32) {
    %c0_i32 = arith.constant 0 : i32
    %c0_i32_0 = arith.constant 0 : i32
    return %arg0, %c0_i32 : i32, i32
  }
}

</mosaic_0001>

<bundles_post_ra>
// kernel: block_idx_info_forward.1
= control target key start
LH: loop header
LB: loop body
LE: loop exit
PB: predicated region body
PF: predicated region fallthrough
CT: control target
= control target key end

     0   :  { %s1601_s18 = smov 0   ;;  %s2236_s0 = inlined_call_operand.vmem [shape: f32[400,33], index: 0, kind: input, shape index: {}]   ;;  %s2237_s1 = inlined_call_operand.vmem [shape: f32[33,128], index: 1, kind: input, shape index: {}]   ;;  %s2238_s2 = inlined_call_operand.vmem [shape: f32[1,128], index: 2, kind: input, shape index: {}]   ;;  %s2239_s3 = inlined_call_operand.vmem [shape: f32[128,320], index: 3, kind: input, shape index: {}]   ;;  %s2240_s4 = inlined_call_operand.vmem [shape: f32[1,320], index: 4, kind: input, shape index: {}]   ;;  %s2241_s5 = inlined_call_operand.vmem [shape: f32[400,320], index: 5, kind: output, shape index: {}]  }
   0x1 LB: > { %s1241_s19 = sadd.s32 4294967295, %s1567_s18   ;;  %p1245_p0 = scmp.ge.s32.totalorder %s1567_s18, 1  ;;  %s1567_s18 = sphi %s1601_s18, %s15_s18  }
   0x2   : > { %p188_p1 = scmp.lt.s32.totalorder %s1567_s18, 3 }
   0x4   : > { %p189_p2 = pnand %p1245_p0, %p188_p1 }
   0x5   : > { %s217_s24 = smul.u32 (!%p189_p2), 25, %s1241_s19 }
   0x6   : > { %192 = sbr.rel (%p189_p2) target bundleno = 515 (0x203), region = 40 }
   0x7   : > { %p218_p3 = scmp.lt.s32.totalorder (!%p189_p2), %s217_s24, 49 }
   0xb   : > { %v259_v0 = vld [vmem:[%s2237_s1 + $0x20] sm:$0x1]  ;;  %vm343_vm0 = vcmask 1040384   ;;  %v1569_v1 = vmov 0.0   ;;  %v258_v2 = vld [vmem:[%s2237_s1 + $0x18] sm:$0xff]  ;;  %vm1570_vm1 = vmmov 0  }
   0xc   : > { %1348 = vmatprep.subr.mxu0 %v1569_v1  ;;  %1540 = vmatprep.subr.mxu1 %v1569_v1  ;;  %v257_v3 = vld [vmem:[%s2237_s1 + $0x10] sm:$0xff]  ;;  %v256_v4 = vld [vmem:[%s2237_s1 + $0x8] sm:$0xff]  ;;  %s2243_s24 = smov (!%p218_p3, %s217_s24), 49  ;;  %v255_v5 = vld [vmem:[%s2237_s1] sm:$0xff]  ;;  %vm267_vm2 = vcmask 269312   ;;  %vm1109_vm3 = vcmask 523264  }
   0xd   : > { %1349 = vmatpush3.msk.msra.mxu0 %vm343_vm0, %v259_v0  ;;  %1358 = vmatprep.mubr.msk.f32.mxu0 %vm1570_vm1, %v1569_v1  ;;  %s1246_s6 = sshll.u32 %s2243_s24, 3  ;;  %v608_v7 = vld [vmem:[%s2239_s3 + $0x170] sm:$0xff]  ;;  %v609_v8 = vld [vmem:[%s2239_s3 + $0x178] sm:$0xff]  ;;  %v607_v11 = vld [vmem:[%s2239_s3 + $0x168] sm:$0xff]  ;;  %s1550_s21 = smul.u32 24, %s2243_s24 }
   0xe   : > { %1350 = vmatprep.subr.mxu0 %v1569_v1  ;;  %1545 = vmatpush3.msk.msra.mxu1 %vm343_vm0, %v259_v0  ;;  %s1639_s9 = scalar_lea.vmem %s2236_s0, %s1246_s6  ;;  %v605_v12 = vld [vmem:[%s2239_s3 + $0x158] sm:$0xff]  ;;  %v606_v14 = vld [vmem:[%s2239_s3 + $0x160] sm:$0xff]  ;;  %v604_v16 = vld [vmem:[%s2239_s3 + $0x150] sm:$0xff] }
   0xf   : > { %1351 = vmatpush3.msra.mxu0 %v258_v2  ;;  %1541 = vmatprep.subr.mxu1 %v1569_v1  ;;  %v230_v6 = vld [vmem:[%s1639_s9] sm:$0xff]  ;;  %v231_v9 = vld [vmem:[%s1639_s9 + $0x8] sm:$0xff]  ;;  %v244_v13 = vld [vmem:[%s1639_s9 + $0x70] sm:$0xff]  ;;  %s2058_s25 = scalar_lea.vmem %s2241_s5, %s1550_s21 }
  0x10   : > { %1352 = vmatprep.subr.mxu0 %v1569_v1  ;;  %1546 = vmatpush3.msra.mxu1 %v258_v2  ;;  %v243_v10 = vld [vmem:[%s1639_s9 + $0x68] sm:$0xff]  ;;  %v232_v15 = vld [vmem:[%s1639_s9 + $0x10] sm:$0xff]  ;;  %v602_v17 = vld [vmem:[%s2239_s3 + $0x140] sm:$0xff] }
  0x11   : > { %1353 = vmatpush3.msra.mxu0 %v257_v3  ;;  %1542 = vmatprep.subr.mxu1 %v1569_v1  ;;  %v245_v18 = vld [vmem:[%s1639_s9 + $0x78] sm:$0xff]  ;;  %v603_v19 = vld [vmem:[%s2239_s3 + $0x148] sm:$0xff]  ;;  %v246_v23 = vld [vmem:[%s1639_s9 + $0x80] sm:$0xff] }
  0x12   : > { %1354 = vmatprep.subr.mxu0 %v1569_v1  ;;  %1547 = vmatpush3.msra.mxu1 %v257_v3  ;;  %v233_v20 = vld [vmem:[%s1639_s9 + $0x18] sm:$0xff]  ;;  %v599_v22 = vld [vmem:[%s2239_s3 + $0x128] sm:$0xff]  ;;  %v600_v24 = vld [vmem:[%s2239_s3 + $0x130] sm:$0xff] }
  0x13   : > { %1355 = vmatpush3.msra.mxu0 %v256_v4  ;;  %1543 = vmatprep.subr.mxu1 %v1569_v1  ;;  %v601_v21 = vld [vmem:[%s2239_s3 + $0x138] sm:$0xff]  ;;  %v234_v25 = vld [vmem:[%s1639_s9 + $0x20] sm:$0xff]  ;;  %v596_v27 = vld [vmem:[%s2239_s3 + $0x110] sm:$0xff] }
  0x14   : > { %1356 = vmatprep.subr.mxu0 %v1569_v1  ;;  %1548 = vmatpush3.msra.mxu1 %v256_v4  ;;  %v598_v26 = vld [vmem:[%s2239_s3 + $0x120] sm:$0xff]  ;;  %v247_v28 = vld [vmem:[%s1639_s9 + $0x88] sm:$0xff]  ;;  %v597_v29 = vld [vmem:[%s2239_s3 + $0x118] sm:$0xff] }
  0x15   : > { %1357 = vmatpush3.msra.mxu0 %v255_v5  ;;  %1544 = vmatprep.subr.mxu1 %v1569_v1  ;;  %v235_v30 = vld [vmem:[%s1639_s9 + $0x28] sm:$0xff]  ;;  %v593_v32 = vld [vmem:[%s2239_s3 + $0xf8] sm:$0xff]  ;;  %v248_v33 = vld [vmem:[%s1639_s9 + $0x90] sm:$0xff] }
  0x16   : > { %1359 = vmatmul.mubr.msk.f32.vlgmr.msra.gmra.mxu0 %vm267_vm2, %v230_v6  ;;  %1549 = vmatpush3.msra.mxu1 %v255_v5  ;;  %v595_v31 = vld [vmem:[%s2239_s3 + $0x108] sm:$0xff]  ;;  %v594_v34 = vld [vmem:[%s2239_s3 + $0x100] sm:$0xff]  ;;  %v236_v35 = vld [vmem:[%s1639_s9 + $0x30] sm:$0xff] }
  0x17   : > { %1361 = vmatprep.mubr.msk.f32.mxu0 %vm1570_vm1, %v1569_v1  ;;  %1397 = vmatprep.mubr.msk.f32.mxu1 %vm1570_vm1, %v1569_v1  ;;  %v592_v36 = vld [vmem:[%s2239_s3 + $0xf0] sm:$0xff]  ;;  %v590_v37 = vld [vmem:[%s2239_s3 + $0xe0] sm:$0xff]  ;;  %v249_v38 = vld [vmem:[%s1639_s9 + $0x98] sm:$0xff] }
  0x18   : > { %1433 = vmatprep.subr.mxu0 %v1569_v1  ;;  %627 = vmatprep.subr.mxu1 %v608_v7  ;;  %v591_v39 = vld [vmem:[%s2239_s3 + $0xe8] sm:$0xff]  ;;  %v237_v40 = vld [vmem:[%s1639_s9 + $0x38] sm:$0xff]  ;;  %v250_v43 = vld [vmem:[%s1639_s9 + $0xa0] sm:$0xff] }
  0x19   : > { %1398 = vmatmul.mubr.msk.f32.vlgmr.msra.gmra.mxu1 %vm267_vm2, %v243_v10  ;;  %1434 = vmatpush3.msra.mxu0 %v609_v8  ;;  %v589_v41 = vld [vmem:[%s2239_s3 + $0xd8] sm:$0xff]  ;;  %v587_v42 = vld [vmem:[%s2239_s3 + $0xc8] sm:$0xff]  ;;  %v588_v44 = vld [vmem:[%s2239_s3 + $0xd0] sm:$0xff] }
  0x1a   : > { %1362 = vmatmul.mubr.msk.f32.gmra.mxu0 %vm267_vm2, %v231_v9  ;;  %1400 = vmatprep.mubr.msk.f32.mxu1 %vm1570_vm1, %v1569_v1  ;;  %v238_v45 = vld [vmem:[%s1639_s9 + $0x40] sm:$0xff]  ;;  %v584_v47 = vld [vmem:[%s2239_s3 + $0xb0] sm:$0xff]  ;;  %v251_v48 = vld [vmem:[%s1639_s9 + $0xa8] sm:$0xff] }
  0x1b   : > { %1364 = vmatprep.mubr.msk.f32.mxu0 %vm1570_vm1, %v1569_v1  ;;  %628 = vmatpush1.msra.mxu1 %v607_v11  ;;  %v586_v46 = vld [vmem:[%s2239_s3 + $0xc0] sm:$0xff]  ;;  %v585_v49 = vld [vmem:[%s2239_s3 + $0xb8] sm:$0xff]  ;;  %v239_v50 = vld [vmem:[%s1639_s9 + $0x48] sm:$0xff] }
  0x1c   : > { %1435 = vmatprep.subr.mxu0 %v1569_v1  ;;  %629 = vmatprep.subr.mxu1 %v605_v12  ;;  %v583_v51 = vld [vmem:[%s2239_s3 + $0xa8] sm:$0xff]  ;;  %v581_v52 = vld [vmem:[%s2239_s3 + $0x98] sm:$0xff]  ;;  %v252_v53 = vld [vmem:[%s1639_s9 + $0xb0] sm:$0xff] }
  0x1d   : > { %1401 = vmatmul.mubr.msk.f32.gmra.mxu1 %vm267_vm2, %v244_v13  ;;  %1436 = vmatpush3.msra.mxu0 %v606_v14  ;;  %v582_v54 = vld [vmem:[%s2239_s3 + $0xa0] sm:$0xff]  ;;  %v240_v55 = vld [vmem:[%s1639_s9 + $0x50] sm:$0xff]  ;;  %v253_v58 = vld [vmem:[%s1639_s9 + $0xb8] sm:$0xff] }
  0x1e   : > { %1365 = vmatmul.mubr.msk.f32.gmra.mxu0 %vm267_vm2, %v232_v15  ;;  %1403 = vmatprep.mubr.msk.f32.mxu1 %vm1570_vm1, %v1569_v1  ;;  %v580_v56 = vld [vmem:[%s2239_s3 + $0x90] sm:$0xff]  ;;  %v578_v57 = vld [vmem:[%s2239_s3 + $0x80] sm:$0xff]  ;;  %v579_v59 = vld [vmem:[%s2239_s3 + $0x88] sm:$0xff] }
  0x1f   : > { %1367 = vmatprep.mubr.msk.f32.mxu0 %vm1570_vm1, %v1569_v1  ;;  %630 = vmatpush1.msra.mxu1 %v604_v16  ;;  %v241_v60 = vld [vmem:[%s1639_s9 + $0x58] sm:$0xff]  ;;  %v575_v62 = vld [vmem:[%s2239_s3 + $0x68] sm:$0xff]  ;;  %v254_v63 = vld [vmem:[%s1639_s9 + $0xc0] sm:$0xff] }
  0x20   : > { %1437 = vmatprep.subr.mxu0 %v1569_v1  ;;  %631 = vmatprep.subr.mxu1 %v602_v17  ;;  %v577_v61 = vld [vmem:[%s2239_s3 + $0x78] sm:$0xff]  ;;  %v576_v0 = vld [vmem:[%s2239_s3 + $0x70] sm:$0xff]  ;;  %v242_v2 = vld [vmem:[%s1639_s9 + $0x60] sm:$0xff] }
  0x21   : > { %1404 = vmatmul.mubr.msk.f32.gmra.mxu1 %vm267_vm2, %v245_v18  ;;  %1438 = vmatpush3.msra.mxu0 %v603_v19  ;;  %v574_v3 = vld [vmem:[%s2239_s3 + $0x60] sm:$0xff]  ;;  %v572_v4 = vld [vmem:[%s2239_s3 + $0x50] sm:$0xff]  ;;  %v571_v5 = vld [vmem:[%s2239_s3 + $0x48] sm:$0xff] }
  0x22   : > { %1368 = vmatmul.mubr.msk.f32.gmra.mxu0 %vm267_vm2, %v233_v20  ;;  %1406 = vmatprep.mubr.msk.f32.mxu1 %vm1570_vm1, %v1569_v1  ;;  %v573_v6 = vld [vmem:[%s2239_s3 + $0x58] sm:$0xff]  ;;  %v568_v8 = vld [vmem:[%s2239_s3 + $0x30] sm:$0xff]  ;;  %v570_v9 = vld [vmem:[%s2239_s3 + $0x40] sm:$0xff] }
  0x23   : > { %1370 = vmatprep.mubr.msk.f32.mxu0 %vm1570_vm1, %v1569_v1  ;;  %632 = vmatpush1.msra.mxu1 %v601_v21  ;;  %v569_v7 = vld [vmem:[%s2239_s3 + $0x38] sm:$0xff]  ;;  %v566_v10 = vld [vmem:[%s2239_s3 + $0x20] sm:$0xff]  ;;  %v567_v12 = vld [vmem:[%s2239_s3 + $0x28] sm:$0xff] }
  0x24   : > { %1439 = vmatprep.subr.mxu0 %v1569_v1  ;;  %633 = vmatprep.subr.mxu1 %v599_v22  ;;  %v565_v11 = vld [vmem:[%s2239_s3 + $0x18] sm:$0xff]  ;;  %v563_v13 = vld [vmem:[%s2239_s3 + $0x8] sm:$0xff]  ;;  %v562_v14 = vld [vmem:[%s2239_s3] sm:$0xff] }
  0x25   : > { %1407 = vmatmul.mubr.msk.f32.gmra.mxu1 %vm267_vm2, %v246_v23  ;;  %1440 = vmatpush3.msra.mxu0 %v600_v24  ;;  %v564_v15 = vld [vmem:[%s2239_s3 + $0x10] sm:$0xff]  ;;  %v1908_v16 = vld [vmem:[%s2238_s2] ss:$0 sm:$0xff] }
  0x26   : > { %1371 = vmatmul.mubr.msk.f32.gmra.mxu0 %vm267_vm2, %v234_v25  ;;  %1409 = vmatprep.mubr.msk.f32.mxu1 %vm1570_vm1, %v1569_v1 }
  0x27   : > { %1373 = vmatprep.mubr.msk.f32.mxu0 %vm1570_vm1, %v1569_v1  ;;  %634 = vmatpush1.msra.mxu1 %v598_v26 }
  0x28   : > { %1441 = vmatprep.subr.mxu0 %v1569_v1  ;;  %635 = vmatprep.subr.mxu1 %v596_v27 }
  0x29   : > { %1410 = vmatmul.mubr.msk.f32.gmra.mxu1 %vm267_vm2, %v247_v28  ;;  %1442 = vmatpush3.msra.mxu0 %v597_v29 }
  0x2a   : > { %1374 = vmatmul.mubr.msk.f32.gmra.mxu0 %vm267_vm2, %v235_v30  ;;  %1412 = vmatprep.mubr.msk.f32.mxu1 %vm1570_vm1, %v1569_v1 }
  0x2b   : > { %1376 = vmatprep.mubr.msk.f32.mxu0 %vm1570_vm1, %v1569_v1  ;;  %636 = vmatpush1.msra.mxu1 %v595_v31 }
  0x2c   : > { %637 = vmatprep.subr.mxu1 %v593_v32  ;;  %1443 = vmatprep.subr.mxu0 %v1569_v1 }
  0x2d   : > { %1413 = vmatmul.mubr.msk.f32.gmra.mxu1 %vm267_vm2, %v248_v33  ;;  %1444 = vmatpush3.msra.mxu0 %v594_v34 }
  0x2e   : > { %1377 = vmatmul.mubr.msk.f32.gmra.mxu0 %vm267_vm2, %v236_v35  ;;  %1415 = vmatprep.mubr.msk.f32.mxu1 %vm1570_vm1, %v1569_v1 }
  0x2f   : > { %1379 = vmatprep.mubr.msk.f32.mxu0 %vm1570_vm1, %v1569_v1  ;;  %638 = vmatpush1.msra.mxu1 %v592_v36 }
  0x30   : > { %639 = vmatprep.subr.mxu1 %v590_v37  ;;  %1445 = vmatprep.subr.mxu0 %v1569_v1 }
  0x31   : > { %1416 = vmatmul.mubr.msk.f32.gmra.mxu1 %vm267_vm2, %v249_v38  ;;  %1446 = vmatpush3.msra.mxu0 %v591_v39 }
  0x32   : > { %1380 = vmatmul.mubr.msk.f32.gmra.mxu0 %vm267_vm2, %v237_v40  ;;  %1418 = vmatprep.mubr.msk.f32.mxu1 %vm1570_vm1, %v1569_v1 }
  0x33   : > { %1382 = vmatprep.mubr.msk.f32.mxu0 %vm1570_vm1, %v1569_v1  ;;  %640 = vmatpush1.msra.mxu1 %v589_v41 }
  0x34   : > { %641 = vmatprep.subr.mxu1 %v587_v42  ;;  %1447 = vmatprep.subr.mxu0 %v1569_v1 }
  0x35   : > { %1419 = vmatmul.mubr.msk.f32.gmra.mxu1 %vm267_vm2, %v250_v43  ;;  %1448 = vmatpush3.msra.mxu0 %v588_v44 }
  0x36   : > { %1383 = vmatmul.mubr.msk.f32.gmra.mxu0 %vm267_vm2, %v238_v45  ;;  %1421 = vmatprep.mubr.msk.f32.mxu1 %vm1570_vm1, %v1569_v1 }
  0x37   : > { %1385 = vmatprep.mubr.msk.f32.mxu0 %vm1570_vm1, %v1569_v1  ;;  %642 = vmatpush1.msra.mxu1 %v586_v46 }
  0x38   : > { %643 = vmatprep.subr.mxu1 %v584_v47  ;;  %1449 = vmatprep.subr.mxu0 %v1569_v1 }
  0x39   : > { %1422 = vmatmul.mubr.msk.f32.gmra.mxu1 %vm267_vm2, %v251_v48  ;;  %1450 = vmatpush3.msra.mxu0 %v585_v49 }
  0x3a   : > { %1386 = vmatmul.mubr.msk.f32.gmra.mxu0 %vm267_vm2, %v239_v50  ;;  %1424 = vmatprep.mubr.msk.f32.mxu1 %vm1570_vm1, %v1569_v1 }
  0x3b   : > { %1388 = vmatprep.mubr.msk.f32.mxu0 %vm1570_vm1, %v1569_v1  ;;  %644 = vmatpush1.msra.mxu1 %v583_v51 }
  0x3c   : > { %645 = vmatprep.subr.mxu1 %v581_v52  ;;  %1451 = vmatprep.subr.mxu0 %v1569_v1 }
  0x3d   : > { %1425 = vmatmul.mubr.msk.f32.gmra.mxu1 %vm267_vm2, %v252_v53  ;;  %1452 = vmatpush3.msra.mxu0 %v582_v54 }
  0x3e   : > { %1389 = vmatmul.mubr.msk.f32.gmra.mxu0 %vm267_vm2, %v240_v55  ;;  %1427 = vmatprep.mubr.msk.f32.mxu1 %vm1570_vm1, %v1569_v1 }
  0x3f   : > { %1391 = vmatprep.mubr.msk.f32.mxu0 %vm1570_vm1, %v1569_v1  ;;  %646 = vmatpush1.msra.mxu1 %v580_v56 }
  0x40   : > { %647 = vmatprep.subr.mxu1 %v578_v57  ;;  %1453 = vmatprep.subr.mxu0 %v1569_v1 }
  0x41   : > { %1428 = vmatmul.mubr.msk.f32.gmra.mxu1 %vm267_vm2, %v253_v58  ;;  %1454 = vmatpush3.msra.mxu0 %v579_v59 }
  0x42   : > { %1392 = vmatmul.mubr.msk.f32.gmra.mxu0 %vm267_vm2, %v241_v60  ;;  %1430 = vmatprep.mubr.msk.f32.mxu1 %vm1570_vm1, %v1569_v1 }
  0x43   : > { %1394 = vmatprep.mubr.msk.f32.mxu0 %vm1570_vm1, %v1569_v1  ;;  %648 = vmatpush1.msra.mxu1 %v577_v61 }
  0x44   : > { %649 = vmatprep.subr.mxu1 %v575_v62  ;;  %1455 = vmatprep.subr.mxu0 %v1569_v1 }
  0x45   : > { %1431 = vmatmul.mubr.msk.f32.gmra.mxu1 %vm267_vm2, %v254_v63  ;;  %1456 = vmatpush3.msra.mxu0 %v576_v0 }
  0x46   : > { %1395 = vmatmul.mubr.msk.f32.gmra.mxu0 %vm267_vm2, %v242_v2  ;;  %650 = vmatpush1.msra.mxu1 %v574_v3 }
  0x47   : > { %651 = vmatprep.subr.mxu1 %v572_v4  ;;  %1457 = vmatprep.subr.mxu0 %v1569_v1 }
  0x48   : > { %652 = vmatpush1.msra.mxu1 %v571_v5  ;;  %1458 = vmatpush3.msra.mxu0 %v573_v6 }
  0x49   : > { %653 = vmatprep.subr.mxu1 %v569_v7  ;;  %1459 = vmatprep.subr.mxu0 %v1569_v1 }
  0x4a   : > { %654 = vmatpush1.msra.mxu1 %v568_v8  ;;  %1460 = vmatpush3.msra.mxu0 %v570_v9 }
  0x4b   : > { %655 = vmatprep.subr.mxu1 %v566_v10  ;;  %1461 = vmatprep.subr.mxu0 %v1569_v1 }
  0x4c   : > { %656 = vmatpush1.msra.mxu1 %v565_v11  ;;  %691 = vmatprep.mubr.f32.mxu1 %v1569_v1 }
  0x4d   : > { %1465 = vmatprep.mubr.msk.f32.mxu0 %vm1570_vm1, %v1569_v1  ;;  %1462 = vmatpush3.msra.mxu0 %v567_v12 }
  0x4e   : > { %657 = vmatprep.subr.mxu1 %v563_v13  ;;  %1463 = vmatprep.subr.mxu0 %v1569_v1 }
  0x4f   : > { %658 = vmatpush1.msra.mxu1 %v562_v14  ;;  %1464 = vmatpush3.msra.mxu0 %v564_v15 }
  0xd6   : > { %v413_v17 = vpop.f32.mrf.mxu0 }
  0xd7   : > { %v414_v18 = vadd.f32 %v1908_v16, %v413_v17 }
  0xd8   : > { %v1360_v19 = vpop.f32.mrf.mxu0 }
  0xd9   : > { %v537_v20 = vmax.f32 %v414_v18, 0.0  ;;  %v1911_v21 = vpop.f32.mrf.mxu1 }
  0xda   : > { %v418_v22 = vpop.f32.mrf.mxu0 }
  0xdb   : > { %v419_v23 = vadd.f32 %v1908_v16, %v418_v22  ;;  %692 = vmatmul.mubr.f32.vlgmr.msra.gmra.mxu1 %v537_v20  ;;  %1466 = vmatmul.mubr.f32.vlgmr.msra.gmra.mxu0 %v537_v20  ;;  %v1399_v24 = vpop.f32.mrf.mxu1 }
  0xdc   : > { %v1363_v25 = vpop.f32.mrf.mxu0  ;;  %697 = vmatprep.mubr.f32.mxu1 %v1569_v1  ;;  %1468 = vmatprep.mubr.msk.f32.mxu0 %vm1570_vm1, %v1569_v1 }
  0xdd   : > { %v538_v26 = vmax.f32 %v419_v23, 0.0  ;;  %v1917_v27 = vpop.f32.mrf.mxu1 }
  0xde   : > { %v423_v28 = vpop.f32.mrf.mxu0 }
  0xdf   : > { %v424_v29 = vadd.f32 %v1908_v16, %v423_v28  ;;  %698 = vmatmul.mubr.f32.gmra.mxu1 %v538_v26  ;;  %1469 = vmatmul.mubr.f32.gmra.mxu0 %v538_v26  ;;  %v1402_v30 = vpop.f32.mrf.mxu1 }
  0xe0   : > { %v1366_v31 = vpop.f32.mrf.mxu0  ;;  %703 = vmatprep.mubr.f32.mxu1 %v1569_v1  ;;  %1471 = vmatprep.mubr.msk.f32.mxu0 %vm1570_vm1, %v1569_v1  ;;  %v479_v30 = vadd.f32 %v1908_v16, %v1911_v21 }
  0xe1   : > { %v539_v32 = vmax.f32 %v424_v29, 0.0  ;;  %v1923_v33 = vpop.f32.mrf.mxu1 }
  0xe2   : > { %v428_v34 = vpop.f32.mrf.mxu0 }
  0xe3   : > { %v429_v35 = vadd.f32 %v1908_v16, %v428_v34  ;;  %704 = vmatmul.mubr.f32.gmra.mxu1 %v539_v32  ;;  %1472 = vmatmul.mubr.f32.gmra.mxu0 %v539_v32  ;;  %v1405_v36 = vpop.f32.mrf.mxu1 }
  0xe4   : > { %v1369_v37 = vpop.f32.mrf.mxu0  ;;  %709 = vmatprep.mubr.f32.mxu1 %v1569_v1  ;;  %1474 = vmatprep.mubr.msk.f32.mxu0 %vm1570_vm1, %v1569_v1  ;;  %v484_v36 = vadd.f32 %v1908_v16, %v1917_v27 }
  0xe5   : > { %v540_v38 = vmax.f32 %v429_v35, 0.0  ;;  %v1929_v39 = vpop.f32.mrf.mxu1  ;;  %v550_v35 = vmax.f32 %v479_v30, 0.0  ;;  %v489_v37 = vadd.f32 %v1908_v16, %v1923_v33 }
  0xe6   : > { %v433_v40 = vpop.f32.mrf.mxu0  ;;  %v551_v21 = vmax.f32 %v484_v36, 0.0  ;;  %v494_v27 = vadd.f32 %v1908_v16, %v1929_v39 }
  0xe7   : > { %v434_v41 = vadd.f32 %v1908_v16, %v433_v40  ;;  %710 = vmatmul.mubr.f32.gmra.mxu1 %v540_v38  ;;  %1475 = vmatmul.mubr.f32.gmra.mxu0 %v540_v38  ;;  %v1408_v42 = vpop.f32.mrf.mxu1  ;;  %v552_v38 = vmax.f32 %v489_v37, 0.0 }
  0xe8   : > { %v1372_v43 = vpop.f32.mrf.mxu0  ;;  %715 = vmatprep.mubr.f32.mxu1 %v1569_v1  ;;  %1477 = vmatprep.mubr.msk.f32.mxu0 %vm1570_vm1, %v1569_v1  ;;  %v553_v40 = vmax.f32 %v494_v27, 0.0 }
  0xe9   : > { %v541_v44 = vmax.f32 %v434_v41, 0.0  ;;  %v1935_v45 = vpop.f32.mrf.mxu1 }
  0xea   : > { %v438_v46 = vpop.f32.mrf.mxu0  ;;  %v499_v33 = vadd.f32 %v1908_v16, %v1935_v45 }
  0xeb   : > { %v439_v47 = vadd.f32 %v1908_v16, %v438_v46  ;;  %716 = vmatmul.mubr.f32.gmra.mxu1 %v541_v44  ;;  %1478 = vmatmul.mubr.f32.gmra.mxu0 %v541_v44  ;;  %v1411_v48 = vpop.f32.mrf.mxu1 }
  0xec   : > { %v1375_v49 = vpop.f32.mrf.mxu0  ;;  %721 = vmatprep.mubr.f32.mxu1 %v1569_v1  ;;  %1480 = vmatprep.mubr.msk.f32.mxu0 %vm1570_vm1, %v1569_v1  ;;  %v554_v41 = vmax.f32 %v499_v33, 0.0 }
  0xed   : > { %v542_v50 = vmax.f32 %v439_v47, 0.0  ;;  %v1941_v51 = vpop.f32.mrf.mxu1 }
  0xee   : > { %v443_v52 = vpop.f32.mrf.mxu0  ;;  %v504_v39 = vadd.f32 %v1908_v16, %v1941_v51 }
  0xef   : > { %v444_v53 = vadd.f32 %v1908_v16, %v443_v52  ;;  %722 = vmatmul.mubr.f32.gmra.mxu1 %v542_v50  ;;  %1481 = vmatmul.mubr.f32.gmra.mxu0 %v542_v50  ;;  %v1414_v54 = vpop.f32.mrf.mxu1 }
  0xf0   : > { %v1378_v55 = vpop.f32.mrf.mxu0  ;;  %727 = vmatprep.mubr.f32.mxu1 %v1569_v1  ;;  %1483 = vmatprep.mubr.msk.f32.mxu0 %vm1570_vm1, %v1569_v1  ;;  %v555_v42 = vmax.f32 %v504_v39, 0.0 }
  0xf1   : > { %v543_v56 = vmax.f32 %v444_v53, 0.0  ;;  %v1947_v57 = vpop.f32.mrf.mxu1  ;;  %v612_v55 = vlaneseq }
  0xf2   : > { %v448_v58 = vpop.f32.mrf.mxu0  ;;  %v509_v43 = vadd.f32 %v1908_v16, %v1947_v57 }
  0xf3   : > { %v449_v59 = vadd.f32 %v1908_v16, %v448_v58  ;;  %728 = vmatmul.mubr.f32.gmra.mxu1 %v543_v56  ;;  %1484 = vmatmul.mubr.f32.gmra.mxu0 %v543_v56  ;;  %v1417_v60 = vpop.f32.mrf.mxu1  ;;  %v613_v56 = vshrl.u32 %v612_v55, 7  ;;  %v610_v58 = vld [vmem:[%s2240_s4] sm:$0x7] }
  0xf4   : > { %v1381_v61 = vpop.f32.mrf.mxu0  ;;  %733 = vmatprep.mubr.f32.mxu1 %v1569_v1  ;;  %1486 = vmatprep.mubr.msk.f32.mxu0 %vm1570_vm1, %v1569_v1  ;;  %v556_v44 = vmax.f32 %v509_v43, 0.0 }
  0xf5   : > { %v544_v62 = vmax.f32 %v449_v59, 0.0  ;;  %v1953_v63 = vpop.f32.mrf.mxu1  ;;  %v614_v57 = vsub.s32 0, %v613_v56  ;;  %v618_v59 = vsub.s32 1, %v613_v56 }
  0xf6   : > { %v453_v0 = vpop.f32.mrf.mxu0  ;;  %v514_v45 = vadd.f32 %v1908_v16, %v1953_v63 }
  0xf7   : > { %v454_v2 = vadd.f32 %v1908_v16, %v453_v0  ;;  %734 = vmatmul.mubr.f32.gmra.mxu1 %v544_v62  ;;  %1487 = vmatmul.mubr.f32.gmra.mxu0 %v544_v62  ;;  %v1420_v3 = vpop.f32.mrf.mxu1  ;;  %v2046_v60 = vrot.slane %v610_v58, %v614_v57  ;;  %v2051_v62 = vrot.slane %v610_v58, %v618_v59 }
  0xf8   : > { %v1384_v4 = vpop.f32.mrf.mxu0  ;;  %739 = vmatprep.mubr.f32.mxu1 %v1569_v1  ;;  %1489 = vmatprep.mubr.msk.f32.mxu0 %vm1570_vm1, %v1569_v1  ;;  %v557_v46 = vmax.f32 %v514_v45, 0.0 }
  0xf9   : > { %v545_v5 = vmax.f32 %v454_v2, 0.0  ;;  %v1959_v6 = vpop.f32.mrf.mxu1 }
  0xfa   : > { %v458_v7 = vpop.f32.mrf.mxu0  ;;  %v519_v47 = vadd.f32 %v1908_v16, %v1959_v6 }
  0xfb   : > { %v459_v8 = vadd.f32 %v1908_v16, %v458_v7  ;;  %740 = vmatmul.mubr.f32.gmra.mxu1 %v545_v5  ;;  %1490 = vmatmul.mubr.f32.gmra.mxu0 %v545_v5  ;;  %v1423_v9 = vpop.f32.mrf.mxu1 }
  0xfc   : > { %v1387_v10 = vpop.f32.mrf.mxu0  ;;  %745 = vmatprep.mubr.f32.mxu1 %v1569_v1  ;;  %1492 = vmatprep.mubr.msk.f32.mxu0 %vm1570_vm1, %v1569_v1  ;;  %v558_v48 = vmax.f32 %v519_v47, 0.0 }
  0xfd   : > { %v546_v11 = vmax.f32 %v459_v8, 0.0  ;;  %v1965_v12 = vpop.f32.mrf.mxu1 }
  0xfe   : > { %v463_v13 = vpop.f32.mrf.mxu0  ;;  %v524_v49 = vadd.f32 %v1908_v16, %v1965_v12 }
  0xff   : > { %v464_v14 = vadd.f32 %v1908_v16, %v463_v13  ;;  %746 = vmatmul.mubr.f32.gmra.mxu1 %v546_v11  ;;  %1493 = vmatmul.mubr.f32.gmra.mxu0 %v546_v11  ;;  %v1426_v15 = vpop.f32.mrf.mxu1 }
 0x100   : > { %v1390_v17 = vpop.f32.mrf.mxu0  ;;  %751 = vmatprep.mubr.f32.mxu1 %v1569_v1  ;;  %1495 = vmatprep.mubr.msk.f32.mxu0 %vm1570_vm1, %v1569_v1  ;;  %v559_v50 = vmax.f32 %v524_v49, 0.0 }
 0x101   : > { %v547_v18 = vmax.f32 %v464_v14, 0.0  ;;  %v1971_v19 = vpop.f32.mrf.mxu1 }
 0x102   : > { %v468_v20 = vpop.f32.mrf.mxu0  ;;  %v529_v51 = vadd.f32 %v1908_v16, %v1971_v19 }
 0x103   : > { %v469_v22 = vadd.f32 %v1908_v16, %v468_v20  ;;  %752 = vmatmul.mubr.f32.gmra.mxu1 %v547_v18  ;;  %1496 = vmatmul.mubr.f32.gmra.mxu0 %v547_v18  ;;  %v1429_v23 = vpop.f32.mrf.mxu1 }
 0x104   : > { %v1393_v24 = vpop.f32.mrf.mxu0  ;;  %757 = vmatprep.mubr.f32.mxu1 %v1569_v1  ;;  %1498 = vmatprep.mubr.msk.f32.mxu0 %vm1570_vm1, %v1569_v1  ;;  %v560_v52 = vmax.f32 %v529_v51, 0.0 }
 0x105   : > { %v548_v25 = vmax.f32 %v469_v22, 0.0  ;;  %v1977_v26 = vpop.f32.mrf.mxu1 }
 0x106   : > { %v473_v28 = vpop.f32.mrf.mxu0  ;;  %v534_v53 = vadd.f32 %v1908_v16, %v1977_v26 }
 0x107   : > { %v474_v29 = vadd.f32 %v1908_v16, %v473_v28  ;;  %758 = vmatmul.mubr.f32.gmra.mxu1 %v548_v25  ;;  %1499 = vmatmul.mubr.f32.gmra.mxu0 %v548_v25  ;;  %v1432_v31 = vpop.f32.mrf.mxu1  ;;  %v622_v16 = vsub.s32 2, %v613_v56 }
 0x108   : > { %v1396_v32 = vpop.f32.mrf.mxu0  ;;  %763 = vmatprep.mubr.f32.mxu1 %v1569_v1  ;;  %1501 = vmatprep.mubr.msk.f32.mxu0 %vm1570_vm1, %v1569_v1  ;;  %v561_v54 = vmax.f32 %v534_v53, 0.0 }
 0x109   : > { %v549_v34 = vmax.f32 %v474_v29, 0.0  ;;  %v2048_v61 = vrot.slane %v610_v58, %v622_v16 }
 0x10b   : > { %764 = vmatmul.mubr.f32.gmra.mxu1 %v549_v34  ;;  %1502 = vmatmul.mubr.f32.gmra.mxu0 %v549_v34 }
 0x10c   : > { %769 = vmatprep.mubr.f32.mxu1 %v1569_v1  ;;  %1504 = vmatprep.mubr.msk.f32.mxu0 %vm1570_vm1, %v1569_v1 }
 0x10f   : > { %770 = vmatmul.mubr.f32.gmra.mxu1 %v550_v35  ;;  %1505 = vmatmul.mubr.f32.gmra.mxu0 %v550_v35 }
 0x110   : > { %775 = vmatprep.mubr.f32.mxu1 %v1569_v1  ;;  %1507 = vmatprep.mubr.msk.f32.mxu0 %vm1570_vm1, %v1569_v1 }
 0x113   : > { %776 = vmatmul.mubr.f32.gmra.mxu1 %v551_v21  ;;  %1508 = vmatmul.mubr.f32.gmra.mxu0 %v551_v21 }
 0x114   : > { %781 = vmatprep.mubr.f32.mxu1 %v1569_v1  ;;  %1510 = vmatprep.mubr.msk.f32.mxu0 %vm1570_vm1, %v1569_v1 }
 0x117   : > { %782 = vmatmul.mubr.f32.gmra.mxu1 %v552_v38  ;;  %1511 = vmatmul.mubr.f32.gmra.mxu0 %v552_v38 }
 0x118   : > { %787 = vmatprep.mubr.f32.mxu1 %v1569_v1  ;;  %1513 = vmatprep.mubr.msk.f32.mxu0 %vm1570_vm1, %v1569_v1 }
 0x11b   : > { %788 = vmatmul.mubr.f32.gmra.mxu1 %v553_v40  ;;  %1514 = vmatmul.mubr.f32.gmra.mxu0 %v553_v40 }
 0x11c   : > { %793 = vmatprep.mubr.f32.mxu1 %v1569_v1  ;;  %1516 = vmatprep.mubr.msk.f32.mxu0 %vm1570_vm1, %v1569_v1 }
 0x11f   : > { %794 = vmatmul.mubr.f32.gmra.mxu1 %v554_v41  ;;  %1517 = vmatmul.mubr.f32.gmra.mxu0 %v554_v41 }
 0x120   : > { %799 = vmatprep.mubr.f32.mxu1 %v1569_v1  ;;  %1519 = vmatprep.mubr.msk.f32.mxu0 %vm1570_vm1, %v1569_v1 }
 0x123   : > { %800 = vmatmul.mubr.f32.gmra.mxu1 %v555_v42  ;;  %1520 = vmatmul.mubr.f32.gmra.mxu0 %v555_v42 }
 0x124   : > { %805 = vmatprep.mubr.f32.mxu1 %v1569_v1  ;;  %1522 = vmatprep.mubr.msk.f32.mxu0 %vm1570_vm1, %v1569_v1 }
 0x127   : > { %806 = vmatmul.mubr.f32.gmra.mxu1 %v556_v44  ;;  %1523 = vmatmul.mubr.f32.gmra.mxu0 %v556_v44 }
 0x128   : > { %811 = vmatprep.mubr.f32.mxu1 %v1569_v1  ;;  %1525 = vmatprep.mubr.msk.f32.mxu0 %vm1570_vm1, %v1569_v1 }
 0x12b   : > { %812 = vmatmul.mubr.f32.gmra.mxu1 %v557_v46  ;;  %1526 = vmatmul.mubr.f32.gmra.mxu0 %v557_v46 }
 0x12c   : > { %817 = vmatprep.mubr.f32.mxu1 %v1569_v1  ;;  %1528 = vmatprep.mubr.msk.f32.mxu0 %vm1570_vm1, %v1569_v1 }
 0x12f   : > { %818 = vmatmul.mubr.f32.gmra.mxu1 %v558_v48  ;;  %1529 = vmatmul.mubr.f32.gmra.mxu0 %v558_v48 }
 0x130   : > { %823 = vmatprep.mubr.f32.mxu1 %v1569_v1  ;;  %1531 = vmatprep.mubr.msk.f32.mxu0 %vm1570_vm1, %v1569_v1 }
 0x133   : > { %824 = vmatmul.mubr.f32.gmra.mxu1 %v559_v50  ;;  %1532 = vmatmul.mubr.f32.gmra.mxu0 %v559_v50 }
 0x134   : > { %829 = vmatprep.mubr.f32.mxu1 %v1569_v1  ;;  %1534 = vmatprep.mubr.msk.f32.mxu0 %vm1570_vm1, %v1569_v1 }
 0x137   : > { %830 = vmatmul.mubr.f32.gmra.mxu1 %v560_v52  ;;  %1535 = vmatmul.mubr.f32.gmra.mxu0 %v560_v52 }
 0x138   : > { %835 = vmatprep.mubr.f32.mxu1 %v1569_v1  ;;  %1537 = vmatprep.mubr.msk.f32.mxu0 %vm1570_vm1, %v1569_v1 }
 0x13b   : > { %836 = vmatmul.mubr.f32.gmra.mxu1 %v561_v54  ;;  %1538 = vmatmul.mubr.f32.gmra.mxu0 %v561_v54 }
 0x19b   : > { %v693_v63 = vpop.f32.mrf.mxu1  ;;  %v908_v1 = vpop.f32.mrf.mxu0 }
 0x19c   : > { %v694_v0 = vadd.f32 %v693_v63, %v2046_v60  ;;  %v909_v2 = vadd.f32 %v908_v1, %v2048_v61 }
 0x19d   : > { %v695_v3 = vpop.f32.mrf.mxu1  ;;  %v1467_v4 = vpop.f32.mrf.mxu0 }
 0x19e   : > { %v1032_v5 = vmax.f32 %v694_v0, 0.0  ;;  %v1034_v6 = vmax.f32 %v909_v2, 0.0  ;;  %v696_v7 = vadd.f32 %v695_v3, %v2051_v62 }
 0x19f   : > { %v699_v8 = vpop.f32.mrf.mxu1  ;;  %v913_v9 = vpop.f32.mrf.mxu0 }
 0x1a0   : > { %1107 = vst [vmem:[%s2058_s25] sm:$0xff] %v1032_v5  ;;  %1110 = vst.msk [vmem:[%s2058_s25 + $0x10] sm:$0xff] %vm1109_vm3, %v1034_v6  ;;  %v1033_v10 = vmax.f32 %v696_v7, 0.0  ;;  %v700_v11 = vadd.f32 %v699_v8, %v2046_v60  ;;  %v914_v12 = vadd.f32 %v913_v9, %v2048_v61 }
 0x1a1   : > { %v701_v13 = vpop.f32.mrf.mxu1  ;;  %v1470_v14 = vpop.f32.mrf.mxu0 }
 0x1a2   : > { %1108 = vst [vmem:[%s2058_s25 + $0x8] sm:$0xff] %v1033_v10  ;;  %v1035_v15 = vmax.f32 %v700_v11, 0.0  ;;  %v1037_v17 = vmax.f32 %v914_v12, 0.0  ;;  %v702_v18 = vadd.f32 %v701_v13, %v2051_v62 }
 0x1a3   : > { %v705_v19 = vpop.f32.mrf.mxu1  ;;  %v918_v20 = vpop.f32.mrf.mxu0 }
 0x1a4   : > { %1111 = vst [vmem:[%s2058_s25 + $0x18] sm:$0xff] %v1035_v15  ;;  %1113 = vst.msk [vmem:[%s2058_s25 + $0x28] sm:$0xff] %vm1109_vm3, %v1037_v17  ;;  %v1036_v22 = vmax.f32 %v702_v18, 0.0  ;;  %v706_v23 = vadd.f32 %v705_v19, %v2046_v60  ;;  %v919_v24 = vadd.f32 %v918_v20, %v2048_v61 }
 0x1a5   : > { %v707_v25 = vpop.f32.mrf.mxu1  ;;  %v1473_v26 = vpop.f32.mrf.mxu0 }
 0x1a6   : > { %1112 = vst [vmem:[%s2058_s25 + $0x20] sm:$0xff] %v1036_v22  ;;  %v1038_v28 = vmax.f32 %v706_v23, 0.0  ;;  %v1040_v29 = vmax.f32 %v919_v24, 0.0  ;;  %v708_v30 = vadd.f32 %v707_v25, %v2051_v62 }
 0x1a7   : > { %v711_v31 = vpop.f32.mrf.mxu1  ;;  %v923_v32 = vpop.f32.mrf.mxu0 }
 0x1a8   : > { %1114 = vst [vmem:[%s2058_s25 + $0x30] sm:$0xff] %v1038_v28  ;;  %1116 = vst.msk [vmem:[%s2058_s25 + $0x40] sm:$0xff] %vm1109_vm3, %v1040_v29  ;;  %v1039_v34 = vmax.f32 %v708_v30, 0.0  ;;  %v712_v35 = vadd.f32 %v711_v31, %v2046_v60  ;;  %v924_v36 = vadd.f32 %v923_v32, %v2048_v61 }
 0x1a9   : > { %v713_v21 = vpop.f32.mrf.mxu1  ;;  %v1476_v37 = vpop.f32.mrf.mxu0 }
 0x1aa   : > { %1115 = vst [vmem:[%s2058_s25 + $0x38] sm:$0xff] %v1039_v34  ;;  %v1041_v38 = vmax.f32 %v712_v35, 0.0  ;;  %v1043_v27 = vmax.f32 %v924_v36, 0.0  ;;  %v714_v40 = vadd.f32 %v713_v21, %v2051_v62 }
 0x1ab   : > { %v717_v33 = vpop.f32.mrf.mxu1  ;;  %v928_v41 = vpop.f32.mrf.mxu0 }
 0x1ac   : > { %1117 = vst [vmem:[%s2058_s25 + $0x48] sm:$0xff] %v1041_v38  ;;  %1119 = vst.msk [vmem:[%s2058_s25 + $0x58] sm:$0xff] %vm1109_vm3, %v1043_v27  ;;  %v1042_v39 = vmax.f32 %v714_v40, 0.0  ;;  %v718_v42 = vadd.f32 %v717_v33, %v2046_v60  ;;  %v929_v43 = vadd.f32 %v928_v41, %v2048_v61 }
 0x1ad   : > { %v719_v44 = vpop.f32.mrf.mxu1  ;;  %v1479_v45 = vpop.f32.mrf.mxu0 }
 0x1ae   : > { %1118 = vst [vmem:[%s2058_s25 + $0x50] sm:$0xff] %v1042_v39  ;;  %v1044_v46 = vmax.f32 %v718_v42, 0.0  ;;  %v1046_v47 = vmax.f32 %v929_v43, 0.0  ;;  %v720_v48 = vadd.f32 %v719_v44, %v2051_v62 }
 0x1af   : > { %v723_v49 = vpop.f32.mrf.mxu1  ;;  %v933_v50 = vpop.f32.mrf.mxu0 }
 0x1b0   : > { %1120 = vst [vmem:[%s2058_s25 + $0x60] sm:$0xff] %v1044_v46  ;;  %1122 = vst.msk [vmem:[%s2058_s25 + $0x70] sm:$0xff] %vm1109_vm3, %v1046_v47  ;;  %v1045_v51 = vmax.f32 %v720_v48, 0.0  ;;  %v724_v52 = vadd.f32 %v723_v49, %v2046_v60  ;;  %v934_v53 = vadd.f32 %v933_v50, %v2048_v61 }
 0x1b1   : > { %v725_v54 = vpop.f32.mrf.mxu1  ;;  %v1482_v55 = vpop.f32.mrf.mxu0 }
 0x1b2   : > { %1121 = vst [vmem:[%s2058_s25 + $0x68] sm:$0xff] %v1045_v51  ;;  %v1047_v56 = vmax.f32 %v724_v52, 0.0  ;;  %v1049_v57 = vmax.f32 %v934_v53, 0.0  ;;  %v726_v16 = vadd.f32 %v725_v54, %v2051_v62 }
 0x1b3   : > { %v729_v58 = vpop.f32.mrf.mxu1  ;;  %v938_v59 = vpop.f32.mrf.mxu0 }
 0x1b4   : > { %1123 = vst [vmem:[%s2058_s25 + $0x78] sm:$0xff] %v1047_v56  ;;  %1125 = vst.msk [vmem:[%s2058_s25 + $0x88] sm:$0xff] %vm1109_vm3, %v1049_v57  ;;  %v1048_v63 = vmax.f32 %v726_v16, 0.0  ;;  %v730_v1 = vadd.f32 %v729_v58, %v2046_v60  ;;  %v939_v0 = vadd.f32 %v938_v59, %v2048_v61 }
 0x1b5   : > { %v731_v2 = vpop.f32.mrf.mxu1  ;;  %v1485_v3 = vpop.f32.mrf.mxu0 }
 0x1b6   : > { %1124 = vst [vmem:[%s2058_s25 + $0x80] sm:$0xff] %v1048_v63  ;;  %v1050_v4 = vmax.f32 %v730_v1, 0.0  ;;  %v1052_v5 = vmax.f32 %v939_v0, 0.0  ;;  %v732_v6 = vadd.f32 %v731_v2, %v2051_v62 }
 0x1b7   : > { %v735_v7 = vpop.f32.mrf.mxu1  ;;  %v943_v8 = vpop.f32.mrf.mxu0 }
 0x1b8   : > { %1126 = vst [vmem:[%s2058_s25 + $0x90] sm:$0xff] %v1050_v4  ;;  %1128 = vst.msk [vmem:[%s2058_s25 + $0xa0] sm:$0xff] %vm1109_vm3, %v1052_v5  ;;  %v1051_v9 = vmax.f32 %v732_v6, 0.0  ;;  %v736_v10 = vadd.f32 %v735_v7, %v2046_v60  ;;  %v944_v11 = vadd.f32 %v943_v8, %v2048_v61 }
 0x1b9   : > { %v737_v12 = vpop.f32.mrf.mxu1  ;;  %v1488_v13 = vpop.f32.mrf.mxu0 }
 0x1ba   : > { %1127 = vst [vmem:[%s2058_s25 + $0x98] sm:$0xff] %v1051_v9  ;;  %v1053_v14 = vmax.f32 %v736_v10, 0.0  ;;  %v1055_v15 = vmax.f32 %v944_v11, 0.0  ;;  %v738_v17 = vadd.f32 %v737_v12, %v2051_v62 }
 0x1bb   : > { %v741_v18 = vpop.f32.mrf.mxu1  ;;  %v948_v19 = vpop.f32.mrf.mxu0 }
 0x1bc   : > { %1129 = vst [vmem:[%s2058_s25 + $0xa8] sm:$0xff] %v1053_v14  ;;  %1131 = vst.msk [vmem:[%s2058_s25 + $0xb8] sm:$0xff] %vm1109_vm3, %v1055_v15  ;;  %v1054_v20 = vmax.f32 %v738_v17, 0.0  ;;  %v742_v22 = vadd.f32 %v741_v18, %v2046_v60  ;;  %v949_v23 = vadd.f32 %v948_v19, %v2048_v61 }
 0x1bd   : > { %v743_v24 = vpop.f32.mrf.mxu1  ;;  %v1491_v25 = vpop.f32.mrf.mxu0 }
 0x1be   : > { %1130 = vst [vmem:[%s2058_s25 + $0xb0] sm:$0xff] %v1054_v20  ;;  %v1056_v26 = vmax.f32 %v742_v22, 0.0  ;;  %v1058_v28 = vmax.f32 %v949_v23, 0.0  ;;  %v744_v29 = vadd.f32 %v743_v24, %v2051_v62 }
 0x1bf   : > { %v747_v30 = vpop.f32.mrf.mxu1  ;;  %v953_v31 = vpop.f32.mrf.mxu0 }
 0x1c0   : > { %1132 = vst [vmem:[%s2058_s25 + $0xc0] sm:$0xff] %v1056_v26  ;;  %1134 = vst.msk [vmem:[%s2058_s25 + $0xd0] sm:$0xff] %vm1109_vm3, %v1058_v28  ;;  %v1057_v32 = vmax.f32 %v744_v29, 0.0  ;;  %v748_v34 = vadd.f32 %v747_v30, %v2046_v60  ;;  %v954_v35 = vadd.f32 %v953_v31, %v2048_v61 }
 0x1c1   : > { %v749_v36 = vpop.f32.mrf.mxu1  ;;  %v1494_v21 = vpop.f32.mrf.mxu0 }
 0x1c2   : > { %1133 = vst [vmem:[%s2058_s25 + $0xc8] sm:$0xff] %v1057_v32  ;;  %v1059_v37 = vmax.f32 %v748_v34, 0.0  ;;  %v1061_v38 = vmax.f32 %v954_v35, 0.0  ;;  %v750_v27 = vadd.f32 %v749_v36, %v2051_v62 }
 0x1c3   : > { %v753_v40 = vpop.f32.mrf.mxu1  ;;  %v958_v33 = vpop.f32.mrf.mxu0 }
 0x1c4   : > { %1135 = vst [vmem:[%s2058_s25 + $0xd8] sm:$0xff] %v1059_v37  ;;  %1137 = vst.msk [vmem:[%s2058_s25 + $0xe8] sm:$0xff] %vm1109_vm3, %v1061_v38  ;;  %v1060_v41 = vmax.f32 %v750_v27, 0.0  ;;  %v754_v39 = vadd.f32 %v753_v40, %v2046_v60  ;;  %v959_v42 = vadd.f32 %v958_v33, %v2048_v61 }
 0x1c5   : > { %v755_v43 = vpop.f32.mrf.mxu1  ;;  %v1497_v44 = vpop.f32.mrf.mxu0 }
 0x1c6   : > { %1136 = vst [vmem:[%s2058_s25 + $0xe0] sm:$0xff] %v1060_v41  ;;  %v1062_v45 = vmax.f32 %v754_v39, 0.0  ;;  %v1064_v46 = vmax.f32 %v959_v42, 0.0  ;;  %v756_v47 = vadd.f32 %v755_v43, %v2051_v62 }
 0x1c7   : > { %v759_v48 = vpop.f32.mrf.mxu1  ;;  %v963_v49 = vpop.f32.mrf.mxu0 }
 0x1c8   : > { %1138 = vst [vmem:[%s2058_s25 + $0xf0] sm:$0xff] %v1062_v45  ;;  %1140 = vst.msk [vmem:[%s2058_s25 + $0x100] sm:$0xff] %vm1109_vm3, %v1064_v46  ;;  %v1063_v50 = vmax.f32 %v756_v47, 0.0  ;;  %v760_v51 = vadd.f32 %v759_v48, %v2046_v60  ;;  %v964_v52 = vadd.f32 %v963_v49, %v2048_v61 }
 0x1c9   : > { %v761_v53 = vpop.f32.mrf.mxu1  ;;  %v1500_v54 = vpop.f32.mrf.mxu0 }
 0x1ca   : > { %1139 = vst [vmem:[%s2058_s25 + $0xf8] sm:$0xff] %v1063_v50  ;;  %v1065_v55 = vmax.f32 %v760_v51, 0.0  ;;  %v1067_v56 = vmax.f32 %v964_v52, 0.0  ;;  %v762_v57 = vadd.f32 %v761_v53, %v2051_v62 }
 0x1cb   : > { %v765_v16 = vpop.f32.mrf.mxu1  ;;  %v968_v58 = vpop.f32.mrf.mxu0 }
 0x1cc   : > { %1141 = vst [vmem:[%s2058_s25 + $0x108] sm:$0xff] %v1065_v55  ;;  %1143 = vst.msk [vmem:[%s2058_s25 + $0x118] sm:$0xff] %vm1109_vm3, %v1067_v56  ;;  %v1066_v59 = vmax.f32 %v762_v57, 0.0  ;;  %v766_v63 = vadd.f32 %v765_v16, %v2046_v60  ;;  %v969_v1 = vadd.f32 %v968_v58, %v2048_v61 }
 0x1cd   : > { %v767_v0 = vpop.f32.mrf.mxu1  ;;  %v1503_v2 = vpop.f32.mrf.mxu0 }
 0x1ce   : > { %1142 = vst [vmem:[%s2058_s25 + $0x110] sm:$0xff] %v1066_v59  ;;  %v1068_v3 = vmax.f32 %v766_v63, 0.0  ;;  %v1070_v4 = vmax.f32 %v969_v1, 0.0  ;;  %v768_v5 = vadd.f32 %v767_v0, %v2051_v62 }
 0x1cf   : > { %v771_v6 = vpop.f32.mrf.mxu1  ;;  %v973_v7 = vpop.f32.mrf.mxu0 }
 0x1d0   : > { %1144 = vst [vmem:[%s2058_s25 + $0x120] sm:$0xff] %v1068_v3  ;;  %1146 = vst.msk [vmem:[%s2058_s25 + $0x130] sm:$0xff] %vm1109_vm3, %v1070_v4  ;;  %v1069_v8 = vmax.f32 %v768_v5, 0.0  ;;  %v772_v9 = vadd.f32 %v771_v6, %v2046_v60  ;;  %v974_v10 = vadd.f32 %v973_v7, %v2048_v61 }
 0x1d1   : > { %v773_v11 = vpop.f32.mrf.mxu1  ;;  %v1506_v12 = vpop.f32.mrf.mxu0 }
 0x1d2   : > { %1145 = vst [vmem:[%s2058_s25 + $0x128] sm:$0xff] %v1069_v8  ;;  %v1071_v13 = vmax.f32 %v772_v9, 0.0  ;;  %v1073_v14 = vmax.f32 %v974_v10, 0.0  ;;  %v774_v15 = vadd.f32 %v773_v11, %v2051_v62 }
 0x1d3   : > { %v777_v17 = vpop.f32.mrf.mxu1  ;;  %v978_v18 = vpop.f32.mrf.mxu0 }
 0x1d4   : > { %1147 = vst [vmem:[%s2058_s25 + $0x138] sm:$0xff] %v1071_v13  ;;  %1149 = vst.msk [vmem:[%s2058_s25 + $0x148] sm:$0xff] %vm1109_vm3, %v1073_v14  ;;  %v1072_v19 = vmax.f32 %v774_v15, 0.0  ;;  %v778_v20 = vadd.f32 %v777_v17, %v2046_v60  ;;  %v979_v22 = vadd.f32 %v978_v18, %v2048_v61 }
 0x1d5   : > { %v779_v23 = vpop.f32.mrf.mxu1  ;;  %v1509_v24 = vpop.f32.mrf.mxu0 }
 0x1d6   : > { %1148 = vst [vmem:[%s2058_s25 + $0x140] sm:$0xff] %v1072_v19  ;;  %v1074_v25 = vmax.f32 %v778_v20, 0.0  ;;  %v1076_v26 = vmax.f32 %v979_v22, 0.0  ;;  %v780_v28 = vadd.f32 %v779_v23, %v2051_v62 }
 0x1d7   : > { %v783_v29 = vpop.f32.mrf.mxu1  ;;  %v983_v30 = vpop.f32.mrf.mxu0 }
 0x1d8   : > { %1150 = vst [vmem:[%s2058_s25 + $0x150] sm:$0xff] %v1074_v25  ;;  %1152 = vst.msk [vmem:[%s2058_s25 + $0x160] sm:$0xff] %vm1109_vm3, %v1076_v26  ;;  %v1075_v31 = vmax.f32 %v780_v28, 0.0  ;;  %v784_v32 = vadd.f32 %v783_v29, %v2046_v60  ;;  %v984_v34 = vadd.f32 %v983_v30, %v2048_v61 }
 0x1d9   : > { %v785_v35 = vpop.f32.mrf.mxu1  ;;  %v1512_v36 = vpop.f32.mrf.mxu0 }
 0x1da   : > { %1151 = vst [vmem:[%s2058_s25 + $0x158] sm:$0xff] %v1075_v31  ;;  %v1077_v21 = vmax.f32 %v784_v32, 0.0  ;;  %v1079_v37 = vmax.f32 %v984_v34, 0.0  ;;  %v786_v38 = vadd.f32 %v785_v35, %v2051_v62 }
 0x1db   : > { %v789_v27 = vpop.f32.mrf.mxu1  ;;  %v988_v40 = vpop.f32.mrf.mxu0 }
 0x1dc   : > { %1153 = vst [vmem:[%s2058_s25 + $0x168] sm:$0xff] %v1077_v21  ;;  %1155 = vst.msk [vmem:[%s2058_s25 + $0x178] sm:$0xff] %vm1109_vm3, %v1079_v37  ;;  %v1078_v33 = vmax.f32 %v786_v38, 0.0  ;;  %v790_v41 = vadd.f32 %v789_v27, %v2046_v60  ;;  %v989_v39 = vadd.f32 %v988_v40, %v2048_v61 }
 0x1dd   : > { %v791_v42 = vpop.f32.mrf.mxu1  ;;  %v1515_v43 = vpop.f32.mrf.mxu0 }
 0x1de   : > { %1154 = vst [vmem:[%s2058_s25 + $0x170] sm:$0xff] %v1078_v33  ;;  %v1080_v44 = vmax.f32 %v790_v41, 0.0  ;;  %v1082_v45 = vmax.f32 %v989_v39, 0.0  ;;  %v792_v46 = vadd.f32 %v791_v42, %v2051_v62 }
 0x1df   : > { %v795_v47 = vpop.f32.mrf.mxu1  ;;  %v993_v48 = vpop.f32.mrf.mxu0 }
 0x1e0   : > { %1156 = vst [vmem:[%s2058_s25 + $0x180] sm:$0xff] %v1080_v44  ;;  %1158 = vst.msk [vmem:[%s2058_s25 + $0x190] sm:$0xff] %vm1109_vm3, %v1082_v45  ;;  %v1081_v49 = vmax.f32 %v792_v46, 0.0  ;;  %v796_v50 = vadd.f32 %v795_v47, %v2046_v60  ;;  %v994_v51 = vadd.f32 %v993_v48, %v2048_v61 }
 0x1e1   : > { %v797_v52 = vpop.f32.mrf.mxu1  ;;  %v1518_v53 = vpop.f32.mrf.mxu0 }
 0x1e2   : > { %1157 = vst [vmem:[%s2058_s25 + $0x188] sm:$0xff] %v1081_v49  ;;  %v1083_v54 = vmax.f32 %v796_v50, 0.0  ;;  %v1085_v55 = vmax.f32 %v994_v51, 0.0  ;;  %v798_v56 = vadd.f32 %v797_v52, %v2051_v62 }
 0x1e3   : > { %v801_v57 = vpop.f32.mrf.mxu1  ;;  %v998_v16 = vpop.f32.mrf.mxu0 }
 0x1e4   : > { %1159 = vst [vmem:[%s2058_s25 + $0x198] sm:$0xff] %v1083_v54  ;;  %1161 = vst.msk [vmem:[%s2058_s25 + $0x1a8] sm:$0xff] %vm1109_vm3, %v1085_v55  ;;  %v1084_v58 = vmax.f32 %v798_v56, 0.0  ;;  %v802_v59 = vadd.f32 %v801_v57, %v2046_v60  ;;  %v999_v63 = vadd.f32 %v998_v16, %v2048_v61 }
 0x1e5   : > { %v803_v1 = vpop.f32.mrf.mxu1  ;;  %v1521_v0 = vpop.f32.mrf.mxu0 }
 0x1e6   : > { %1160 = vst [vmem:[%s2058_s25 + $0x1a0] sm:$0xff] %v1084_v58  ;;  %v1086_v2 = vmax.f32 %v802_v59, 0.0  ;;  %v1088_v3 = vmax.f32 %v999_v63, 0.0  ;;  %v804_v4 = vadd.f32 %v803_v1, %v2051_v62 }
 0x1e7   : > { %v807_v5 = vpop.f32.mrf.mxu1  ;;  %v1003_v6 = vpop.f32.mrf.mxu0 }
 0x1e8   : > { %1162 = vst [vmem:[%s2058_s25 + $0x1b0] sm:$0xff] %v1086_v2  ;;  %1164 = vst.msk [vmem:[%s2058_s25 + $0x1c0] sm:$0xff] %vm1109_vm3, %v1088_v3  ;;  %v1087_v7 = vmax.f32 %v804_v4, 0.0  ;;  %v808_v8 = vadd.f32 %v807_v5, %v2046_v60  ;;  %v1004_v9 = vadd.f32 %v1003_v6, %v2048_v61 }
 0x1e9   : > { %v809_v10 = vpop.f32.mrf.mxu1  ;;  %v1524_v11 = vpop.f32.mrf.mxu0 }
 0x1ea   : > { %1163 = vst [vmem:[%s2058_s25 + $0x1b8] sm:$0xff] %v1087_v7  ;;  %v1089_v12 = vmax.f32 %v808_v8, 0.0  ;;  %v1091_v13 = vmax.f32 %v1004_v9, 0.0  ;;  %v810_v14 = vadd.f32 %v809_v10, %v2051_v62 }
 0x1eb   : > { %v813_v15 = vpop.f32.mrf.mxu1  ;;  %v1008_v17 = vpop.f32.mrf.mxu0 }
 0x1ec   : > { %1165 = vst [vmem:[%s2058_s25 + $0x1c8] sm:$0xff] %v1089_v12  ;;  %1167 = vst.msk [vmem:[%s2058_s25 + $0x1d8] sm:$0xff] %vm1109_vm3, %v1091_v13  ;;  %v1090_v18 = vmax.f32 %v810_v14, 0.0  ;;  %v814_v19 = vadd.f32 %v813_v15, %v2046_v60  ;;  %v1009_v20 = vadd.f32 %v1008_v17, %v2048_v61 }
 0x1ed   : > { %v815_v22 = vpop.f32.mrf.mxu1  ;;  %v1527_v23 = vpop.f32.mrf.mxu0 }
 0x1ee   : > { %1166 = vst [vmem:[%s2058_s25 + $0x1d0] sm:$0xff] %v1090_v18  ;;  %v1092_v24 = vmax.f32 %v814_v19, 0.0  ;;  %v1094_v25 = vmax.f32 %v1009_v20, 0.0  ;;  %v816_v26 = vadd.f32 %v815_v22, %v2051_v62 }
 0x1ef   : > { %v819_v28 = vpop.f32.mrf.mxu1  ;;  %v1013_v29 = vpop.f32.mrf.mxu0 }
 0x1f0   : > { %1168 = vst [vmem:[%s2058_s25 + $0x1e0] sm:$0xff] %v1092_v24  ;;  %1170 = vst.msk [vmem:[%s2058_s25 + $0x1f0] sm:$0xff] %vm1109_vm3, %v1094_v25  ;;  %v1093_v30 = vmax.f32 %v816_v26, 0.0  ;;  %v820_v31 = vadd.f32 %v819_v28, %v2046_v60  ;;  %v1014_v32 = vadd.f32 %v1013_v29, %v2048_v61 }
 0x1f1   : > { %v821_v34 = vpop.f32.mrf.mxu1  ;;  %v1530_v35 = vpop.f32.mrf.mxu0 }
 0x1f2   : > { %1169 = vst [vmem:[%s2058_s25 + $0x1e8] sm:$0xff] %v1093_v30  ;;  %v1095_v36 = vmax.f32 %v820_v31, 0.0  ;;  %v1097_v21 = vmax.f32 %v1014_v32, 0.0  ;;  %v822_v37 = vadd.f32 %v821_v34, %v2051_v62 }
 0x1f3   : > { %v825_v38 = vpop.f32.mrf.mxu1  ;;  %v1018_v27 = vpop.f32.mrf.mxu0 }
 0x1f4   : > { %1171 = vst [vmem:[%s2058_s25 + $0x1f8] sm:$0xff] %v1095_v36  ;;  %1173 = vst.msk [vmem:[%s2058_s25 + $0x208] sm:$0xff] %vm1109_vm3, %v1097_v21  ;;  %v1096_v40 = vmax.f32 %v822_v37, 0.0  ;;  %v826_v33 = vadd.f32 %v825_v38, %v2046_v60  ;;  %v1019_v41 = vadd.f32 %v1018_v27, %v2048_v61 }
 0x1f5   : > { %v827_v39 = vpop.f32.mrf.mxu1  ;;  %v1533_v42 = vpop.f32.mrf.mxu0 }
 0x1f6   : > { %1172 = vst [vmem:[%s2058_s25 + $0x200] sm:$0xff] %v1096_v40  ;;  %v1098_v43 = vmax.f32 %v826_v33, 0.0  ;;  %v1100_v44 = vmax.f32 %v1019_v41, 0.0  ;;  %v828_v45 = vadd.f32 %v827_v39, %v2051_v62 }
 0x1f7   : > { %v831_v46 = vpop.f32.mrf.mxu1  ;;  %v1023_v47 = vpop.f32.mrf.mxu0 }
 0x1f8   : > { %1174 = vst [vmem:[%s2058_s25 + $0x210] sm:$0xff] %v1098_v43  ;;  %1176 = vst.msk [vmem:[%s2058_s25 + $0x220] sm:$0xff] %vm1109_vm3, %v1100_v44  ;;  %v1099_v48 = vmax.f32 %v828_v45, 0.0  ;;  %v832_v49 = vadd.f32 %v831_v46, %v2046_v60  ;;  %v1024_v50 = vadd.f32 %v1023_v47, %v2048_v61 }
 0x1f9   : > { %v833_v51 = vpop.f32.mrf.mxu1  ;;  %v1536_v52 = vpop.f32.mrf.mxu0 }
 0x1fa   : > { %1175 = vst [vmem:[%s2058_s25 + $0x218] sm:$0xff] %v1099_v48  ;;  %v1101_v53 = vmax.f32 %v832_v49, 0.0  ;;  %v1103_v54 = vmax.f32 %v1024_v50, 0.0  ;;  %v834_v55 = vadd.f32 %v833_v51, %v2051_v62 }
 0x1fb   : > { %v837_v56 = vpop.f32.mrf.mxu1  ;;  %v1028_v57 = vpop.f32.mrf.mxu0 }
 0x1fc   : > { %1177 = vst [vmem:[%s2058_s25 + $0x228] sm:$0xff] %v1101_v53  ;;  %1179 = vst.msk [vmem:[%s2058_s25 + $0x238] sm:$0xff] %vm1109_vm3, %v1103_v54  ;;  %v1102_v16 = vmax.f32 %v834_v55, 0.0  ;;  %v838_v58 = vadd.f32 %v837_v56, %v2046_v60  ;;  %v1029_v59 = vadd.f32 %v1028_v57, %v2048_v61 }
 0x1fd   : > { %v839_v63 = vpop.f32.mrf.mxu1  ;;  %v1539_v1 = vpop.f32.mrf.mxu0 }
 0x1fe   : > { %1178 = vst [vmem:[%s2058_s25 + $0x230] sm:$0xff] %v1102_v16  ;;  %v1104_v0 = vmax.f32 %v838_v58, 0.0  ;;  %v1106_v2 = vmax.f32 %v1029_v59, 0.0  ;;  %v840_v3 = vadd.f32 %v839_v63, %v2051_v62 }
 0x200   : > { %1180 = vst [vmem:[%s2058_s25 + $0x240] sm:$0xff] %v1104_v0  ;;  %1182 = vst.msk [vmem:[%s2058_s25 + $0x250] sm:$0xff] %vm1109_vm3, %v1106_v2  ;;  %v1105_v4 = vmax.f32 %v840_v3, 0.0 }
 0x202   : > { %1181 = vst [vmem:[%s2058_s25 + $0x248] sm:$0xff] %v1105_v4 }
 0x203 PF: > { %s15_s18 = sadd.s32 1, %s1567_s18  }
 0x204   : > { %p12_p4 = scmp.ge.s32.totalorder %s15_s18, 4  }
 0x206   :  { %14 = sbr.rel (!%p12_p4) target bundleno = 1 (0x1), region = 70 }

</bundles_post_ra>
